<compile_context>
chip_gen: v5e
topology: v5e:2x2
jax: 0.10.0
libtpu: 0.0.40
codegen_flags: <defaults>
</compile_context>

<pallas_src>
import jax
import jax.numpy as jnp
import numpy as np
from jax.experimental import pallas as pl
from jax.experimental.pallas import tpu as pltpu


def _round_up(x, m):
    return ((x + m - 1) // m) * m


# ----------------------------------------------------------------------------
# Fused Pallas kernel: all GCN layers in one invocation.
#   refs = (a_ref, x_ref, w0, b0, w1, b1, ..., o_ref)
#   a_ref: bf16 [Np, Np]       x_ref: bf16 [Np, D0p]
#   w_l:   bf16 [Dinp, Doutp]  b_l:   f32  [1, Doutp]
#   o_ref: f32  [Np, Dlastp]
# ----------------------------------------------------------------------------
def make_gbt_kernel(num_layers):
    def kernel(*refs):
        a_ref, x_ref = refs[0], refs[1]
        o_ref = refs[-1]
        wb = refs[2:-1]

        a = a_ref[...]                       # bf16, resident in VMEM throughout
        h = x_ref[...]                       # bf16 activation
        h_f32 = None
        for l in range(num_layers):          # static unrolled layer loop
            w = wb[2 * l][...]               # bf16 [Dinp, Doutp]
            b = wb[2 * l + 1][...]           # f32  [1, Doutp]
            din_p, dout_p = w.shape
            if dout_p <= din_p:
                # Â @ (H @ W): the N²-sized matmul sees the smaller feature dim.
                t = jnp.dot(h, w, preferred_element_type=jnp.float32)
                agg = jnp.dot(a, t.astype(jnp.bfloat16),
                              preferred_element_type=jnp.float32)
            else:
                # (Â @ H) @ W
                t = jnp.dot(a, h, preferred_element_type=jnp.float32)
                agg = jnp.dot(t.astype(jnp.bfloat16), w,
                              preferred_element_type=jnp.float32)
            h_f32 = jnp.maximum(agg + b, 0.0)          # bias + ReLU in f32
            h = h_f32.astype(jnp.bfloat16)
        o_ref[...] = h_f32
    return kernel


# ----------------------------------------------------------------------------
# Glue (plain JAX): symmetric-normalized dense adjacency from edge_index,
# mirroring PyG GCNConv's gcn_norm with add_remaining_self_loops (existing
# self-loops are replaced by exactly one weight-1 self-loop per node).
# ----------------------------------------------------------------------------
def normalized_adjacency(edge_index, num_nodes):
    src = edge_index[0]
    dst = edge_index[1]
    not_loop = (src != dst).astype(jnp.float32)
    a = jnp.zeros((num_nodes, num_nodes), dtype=jnp.float32)
    a = a.at[dst, src].add(not_loop)               # message from src -> dst
    a = a + jnp.eye(num_nodes, dtype=jnp.float32)  # exactly one self-loop each
    deg = jnp.sum(a, axis=1)                       # in-degree incl. self-loop
    dinv = jnp.where(deg > 0, jax.lax.rsqrt(deg), 0.0)
    return dinv[:, None] * a * dinv[None, :]


# ----------------------------------------------------------------------------
# Parameter init matching the Encoder layer shapes:
#   conv0: num_feature -> 2*num_hidden
#   conv1..k-2: 2*num_hidden -> 2*num_hidden
#   conv[k-1]: 2*num_hidden -> num_hidden
# ----------------------------------------------------------------------------
def init_gbt_params(key, num_feature, num_hidden, num_layers):
    assert num_layers >= 2
    dims = [num_feature] + [2 * num_hidden] * (num_layers - 1) + [num_hidden]
    params = []
    for i in range(num_layers):
        fin, fout = dims[i], dims[i + 1]
        key, kw, kb = jax.random.split(key, 3)
        scale = jnp.sqrt(6.0 / (fin + fout))
        w = jax.random.uniform(kw, (fin, fout), jnp.float32, -scale, scale)
        b = 0.01 * jax.random.normal(kb, (1, fout), jnp.float32)
        params.append((w, b))
    return params


# ----------------------------------------------------------------------------
# GBT forward: pad -> single fused pallas_call -> slice.
# ----------------------------------------------------------------------------
@jax.jit
def gbt_forward(params, x, edge_index):
    num_layers = len(params)
    n, d_in = x.shape
    d_out = params[-1][0].shape[1]

    a_hat = normalized_adjacency(edge_index, n)

    # Pad node dim to a sublane multiple, feature dims to lane multiples.
    n_pad = _round_up(n, 8)
    d_in_pad = _round_up(d_in, 128)

    a_p = jnp.zeros((n_pad, n_pad), jnp.bfloat16).at[:n, :n].set(
        a_hat.astype(jnp.bfloat16))
    x_p = jnp.zeros((n_pad, d_in_pad), jnp.bfloat16).at[:n, :d_in].set(
        x.astype(jnp.bfloat16))

    wb_inputs = []
    for (w, b) in params:
        fi, fo = w.shape
        fi_p, fo_p = _round_up(fi, 128), _round_up(fo, 128)
        w_p = jnp.zeros((fi_p, fo_p), jnp.bfloat16).at[:fi, :fo].set(
            w.astype(jnp.bfloat16))
        b_p = jnp.zeros((1, fo_p), jnp.float32).at[:, :fo].set(b)
        wb_inputs += [w_p, b_p]
    d_out_pad = wb_inputs[-2].shape[1]

    in_specs = [
        pl.BlockSpec((n_pad, n_pad), lambda i: (0, 0)),
        pl.BlockSpec((n_pad, d_in_pad), lambda i: (0, 0)),
    ]
    for arr in wb_inputs:
        in_specs.append(pl.BlockSpec(arr.shape, lambda i: (0, 0)))

    out_p = pl.pallas_call(
        make_gbt_kernel(num_layers),
        out_shape=jax.ShapeDtypeStruct((n_pad, d_out_pad), jnp.float32),
        grid=(1,),
        in_specs=in_specs,
        out_specs=pl.BlockSpec((n_pad, d_out_pad), lambda i: (0, 0)),
        compiler_params=pltpu.CompilerParams(
            dimension_semantics=("arbitrary",),
            vmem_limit_bytes=48 * 1024 * 1024),
    )(a_p, x_p, *wb_inputs)

    return out_p[:n, :d_out]


# Pure-JAX f32 reference (same math, no padding / bf16) for a sanity check.
def gbt_forward_ref(params, x, edge_index):
    a_hat = normalized_adjacency(edge_index, x.shape[0])
    h = x
    for (w, b) in params:
        h = jnp.maximum(a_hat @ (h @ w) + b, 0.0)
    return h


# ----------------------------------------------------------------------------
# Driver
# ----------------------------------------------------------------------------
if __name__ == "__main__":
    key = jax.random.PRNGKey(0)

    N = 16          # nodes
    F = 32          # num_feature
    H = 16          # num_hidden (estimate != 1 branch)
    NUM_LAYERS = 2  # args.num_layers (>= 2)
    E = 40          # directed edges

    key, kx, ksrc, kdst, kp = jax.random.split(key, 5)
    x = jax.random.normal(kx, (N, F), jnp.float32)
    src = jax.random.randint(ksrc, (E,), 0, N, dtype=jnp.int32)
    dst = jax.random.randint(kdst, (E,), 0, N, dtype=jnp.int32)
    edge_index = jnp.stack([src, dst], axis=0)  # [2, E]

    params = init_gbt_params(kp, F, H, NUM_LAYERS)

    out = gbt_forward(params, x, edge_index)
    out = jax.block_until_ready(out)

    assert out.shape == (N, H), out.shape
    assert bool(jnp.all(jnp.isfinite(out)))
    assert bool(jnp.all(out >= 0.0))  # ReLU output is non-negative

    ref = gbt_forward_ref(params, x, edge_index)
    np.testing.assert_allclose(np.asarray(out), np.asarray(ref),
                               rtol=1e-1, atol=1e-1)

    print("KERNEL_OK")
</pallas_src>

<mosaic_0001>
module attributes {stable_mosaic.version = 11 : i64} {
  func.func @kernel(%arg0: i32, %arg1: memref<16x16xbf16, #tpu.memory_space<vmem>>, %arg2: memref<16x128xbf16, #tpu.memory_space<vmem>>, %arg3: memref<128x128xbf16, #tpu.memory_space<vmem>>, %arg4: memref<1x128xf32, #tpu.memory_space<vmem>>, %arg5: memref<128x128xbf16, #tpu.memory_space<vmem>>, %arg6: memref<1x128xf32, #tpu.memory_space<vmem>>, %arg7: memref<16x128xf32, #tpu.memory_space<vmem>>) attributes {dimension_semantics = [#tpu.dimension_semantics<arbitrary>], iteration_bounds = array<i64: 1>, scalar_prefetch = 0 : i64, scratch_operands = 0 : i64, tpu.core_type = #tpu.core_type<tc>, window_params = [{pipeline_mode = #tpu.pipeline_mode<synchronous>, transform_indices = @transform_0, window_bounds = array<i64: 16, 16>}, {pipeline_mode = #tpu.pipeline_mode<synchronous>, transform_indices = @transform_1, window_bounds = array<i64: 16, 128>}, {pipeline_mode = #tpu.pipeline_mode<synchronous>, transform_indices = @transform_2, window_bounds = array<i64: 128, 128>}, {pipeline_mode = #tpu.pipeline_mode<synchronous>, transform_indices = @transform_3, window_bounds = array<i64: 1, 128>}, {pipeline_mode = #tpu.pipeline_mode<synchronous>, transform_indices = @transform_4, window_bounds = array<i64: 128, 128>}, {pipeline_mode = #tpu.pipeline_mode<synchronous>, transform_indices = @transform_5, window_bounds = array<i64: 1, 128>}, {pipeline_mode = #tpu.pipeline_mode<synchronous>, transform_indices = @transform_6, window_bounds = array<i64: 16, 128>}]} {
    %c0 = arith.constant 0 : index
    %c0_0 = arith.constant 0 : index
    %0 = vector.load %arg1[%c0, %c0_0] : memref<16x16xbf16, #tpu.memory_space<vmem>>, vector<16x16xbf16>
    %c0_1 = arith.constant 0 : index
    %c0_2 = arith.constant 0 : index
    %1 = vector.load %arg2[%c0_1, %c0_2] : memref<16x128xbf16, #tpu.memory_space<vmem>>, vector<16x128xbf16>
    %c0_3 = arith.constant 0 : index
    %c0_4 = arith.constant 0 : index
    %2 = vector.load %arg3[%c0_3, %c0_4] : memref<128x128xbf16, #tpu.memory_space<vmem>>, vector<128x128xbf16>
    %c0_5 = arith.constant 0 : index
    %c0_6 = arith.constant 0 : index
    %3 = vector.load %arg4[%c0_5, %c0_6] : memref<1x128xf32, #tpu.memory_space<vmem>>, vector<1x128xf32>
    %cst = arith.constant dense<0.000000e+00> : vector<16x128xf32>
    %4 = tpu.matmul %1, %2, %cst {dimension_numbers = #tpu.dot_dimension_numbers<[1], [0], [0], [1], [0, 0, 1, 1], [], []>} : vector<16x128xbf16>, vector<128x128xbf16>, vector<16x128xf32> -> vector<16x128xf32>
    %5 = arith.truncf %4 : vector<16x128xf32> to vector<16x128xbf16>
    %cst_7 = arith.constant dense<0.000000e+00> : vector<16x128xf32>
    %6 = tpu.matmul %0, %5, %cst_7 {dimension_numbers = #tpu.dot_dimension_numbers<[1], [0], [0], [1], [0, 0, 1, 1], [], []>} : vector<16x16xbf16>, vector<16x128xbf16>, vector<16x128xf32> -> vector<16x128xf32>
    %7 = vector.broadcast %3 : vector<1x128xf32> to vector<16x128xf32>
    %8 = arith.addf %6, %7 : vector<16x128xf32>
    %cst_8 = arith.constant 0.000000e+00 : f32
    %9 = vector.broadcast %cst_8 : f32 to vector<16x128xf32>
    %10 = arith.maximumf %8, %9 : vector<16x128xf32>
    %11 = arith.truncf %10 : vector<16x128xf32> to vector<16x128xbf16>
    %c0_9 = arith.constant 0 : index
    %c0_10 = arith.constant 0 : index
    %12 = vector.load %arg5[%c0_9, %c0_10] : memref<128x128xbf16, #tpu.memory_space<vmem>>, vector<128x128xbf16>
    %c0_11 = arith.constant 0 : index
    %c0_12 = arith.constant 0 : index
    %13 = vector.load %arg6[%c0_11, %c0_12] : memref<1x128xf32, #tpu.memory_space<vmem>>, vector<1x128xf32>
    %cst_13 = arith.constant dense<0.000000e+00> : vector<16x128xf32>
    %14 = tpu.matmul %11, %12, %cst_13 {dimension_numbers = #tpu.dot_dimension_numbers<[1], [0], [0], [1], [0, 0, 1, 1], [], []>} : vector<16x128xbf16>, vector<128x128xbf16>, vector<16x128xf32> -> vector<16x128xf32>
    %15 = arith.truncf %14 : vector<16x128xf32> to vector<16x128xbf16>
    %cst_14 = arith.constant dense<0.000000e+00> : vector<16x128xf32>
    %16 = tpu.matmul %0, %15, %cst_14 {dimension_numbers = #tpu.dot_dimension_numbers<[1], [0], [0], [1], [0, 0, 1, 1], [], []>} : vector<16x16xbf16>, vector<16x128xbf16>, vector<16x128xf32> -> vector<16x128xf32>
    %17 = vector.broadcast %13 : vector<1x128xf32> to vector<16x128xf32>
    %18 = arith.addf %16, %17 : vector<16x128xf32>
    %cst_15 = arith.constant 0.000000e+00 : f32
    %19 = vector.broadcast %cst_15 : f32 to vector<16x128xf32>
    %20 = arith.maximumf %18, %19 : vector<16x128xf32>
    %c0_16 = arith.constant 0 : index
    %c0_17 = arith.constant 0 : index
    %21 = vector.load %arg7[%c0_16, %c0_17] : memref<16x128xf32, #tpu.memory_space<vmem>>, vector<16x128xf32>
    tpu.vector_store %arg7[%c0_16, %c0_17], %20 {strides = array<i32>} : memref<16x128xf32, #tpu.memory_space<vmem>>, vector<16x128xf32>,
    return
  }
  func.func @transform_0(%arg0: i32) -> (i32, i32) {
    %c0_i32 = arith.constant 0 : i32
    %c0_i32_0 = arith.constant 0 : i32
    %c0_i32_1 = arith.constant 0 : i32
    return %c0_i32, %c0_i32_0 : i32, i32
  }
  func.func @transform_1(%arg0: i32) -> (i32, i32) {
    %c0_i32 = arith.constant 0 : i32
    %c0_i32_0 = arith.constant 0 : i32
    %c0_i32_1 = arith.constant 0 : i32
    return %c0_i32, %c0_i32_0 : i32, i32
  }
  func.func @transform_2(%arg0: i32) -> (i32, i32) {
    %c0_i32 = arith.constant 0 : i32
    %c0_i32_0 = arith.constant 0 : i32
    %c0_i32_1 = arith.constant 0 : i32
    return %c0_i32, %c0_i32_0 : i32, i32
  }
  func.func @transform_3(%arg0: i32) -> (i32, i32) {
    %c0_i32 = arith.constant 0 : i32
    %c0_i32_0 = arith.constant 0 : i32
    %c0_i32_1 = arith.constant 0 : i32
    return %c0_i32, %c0_i32_0 : i32, i32
  }
  func.func @transform_4(%arg0: i32) -> (i32, i32) {
    %c0_i32 = arith.constant 0 : i32
    %c0_i32_0 = arith.constant 0 : i32
    %c0_i32_1 = arith.constant 0 : i32
    return %c0_i32, %c0_i32_0 : i32, i32
  }
  func.func @transform_5(%arg0: i32) -> (i32, i32) {
    %c0_i32 = arith.constant 0 : i32
    %c0_i32_0 = arith.constant 0 : i32
    %c0_i32_1 = arith.constant 0 : i32
    return %c0_i32, %c0_i32_0 : i32, i32
  }
  func.func @transform_6(%arg0: i32) -> (i32, i32) {
    %c0_i32 = arith.constant 0 : i32
    %c0_i32_0 = arith.constant 0 : i32
    %c0_i32_1 = arith.constant 0 : i32
    return %c0_i32, %c0_i32_0 : i32, i32
  }
}

</mosaic_0001>

<bundles_post_ra>
// kernel: gbt_forward.1
= control target key start
LH: loop header
LB: loop body
LE: loop exit
PB: predicated region body
PF: predicated region fallthrough
CT: control target
= control target key end

     0   :  { %s489_s0 = inlined_call_operand.vmem [shape: bf16[16,16], index: 0, kind: input, shape index: {}]   ;;  %s490_s1 = inlined_call_operand.vmem [shape: bf16[16,128], index: 1, kind: input, shape index: {}]   ;;  %s491_s2 = inlined_call_operand.vmem [shape: bf16[128,128], index: 2, kind: input, shape index: {}]   ;;  %s492_s3 = inlined_call_operand.vmem [shape: f32[1,128], index: 3, kind: input, shape index: {}]   ;;  %s493_s4 = inlined_call_operand.vmem [shape: bf16[128,128], index: 4, kind: input, shape index: {}]   ;;  %s494_s5 = inlined_call_operand.vmem [shape: f32[1,128], index: 5, kind: input, shape index: {}]   ;;  %s495_s6 = inlined_call_operand.hbm [shape: f32[16,128], index: 6, kind: output, shape index: {}]  }
   0x1   :  { %v346_v0 = vld [vmem:[%s491_s2 + $0x38] sm:$0xff]  ;;  %v345_v1 = vld [vmem:[%s491_s2 + $0x30] sm:$0xff] }
   0x2   :  { %100 = vmatpush.bf16.msra.mxu0 %v346_v0 }
   0x3   :  { %11 = vsyncpa [#allocation3], 0  ;;  %v344_v2 = vld [vmem:[%s491_s2 + $0x28] sm:$0xff]  ;;  %v343_v3 = vld [vmem:[%s491_s2 + $0x20] sm:$0xff]  ;;  %vm123_vm0 = vcmask 130048   ;;  %s251_s12 = sshll.u32 %s495_s6, 4  ;;  %s252_s12 = int_to_ptr.hbm [resolvable:$true] %s251_s12 }
   0x4   :  { %v342_v4 = vld [vmem:[%s491_s2 + $0x18] sm:$0xff]  ;;  %v341_v5 = vld [vmem:[%s491_s2 + $0x10] sm:$0xff]  ;;  %v340_v6 = vld [vmem:[%s491_s2 + $0x8] sm:$0xff]  ;;  %s387_s13 = smov 128   ;;  %s388_s14 = smov 8  }
   0x5   :  { %v339_v7 = vld [vmem:[%s491_s2] sm:$0xff]  ;;  %v354_v9 = vld [vmem:[%s493_s4 + $0x38] sm:$0xff]  ;;  %v353_v10 = vld [vmem:[%s493_s4 + $0x30] sm:$0xff] }
   0x6   :  { %101 = vmatpush.bf16.msra.mxu0 %v345_v1  ;;  %v338_v8 = vld [vmem:[%s490_s1] sm:$0xff]  ;;  %209 = vmatpush.bf16.msra.mxu2 %v354_v9  ;;  %v352_v11 = vld [vmem:[%s493_s4 + $0x28] sm:$0xff]  ;;  %v350_v17 = vld [vmem:[%s493_s4 + $0x18] sm:$0xff] }
   0x7   :  { %v351_v12 = vld [vmem:[%s493_s4 + $0x20] sm:$0xff]  ;;  %v349_v18 = vld [vmem:[%s493_s4 + $0x10] sm:$0xff]  ;;  %v348_v19 = vld [vmem:[%s493_s4 + $0x8] sm:$0xff] }
   0x8   :  { %v337_v16 = vld [vmem:[%s489_s0] sm:$0xff] }
   0x9   :  { %v347_v20 = vld [vmem:[%s493_s4] sm:$0xff] }
   0xa   :  { %102 = vmatpush.bf16.msra.mxu0 %v344_v2  ;;  %210 = vmatpush.bf16.msra.mxu2 %v353_v10  ;;  %v358_v22 = vld [vmem:[%s492_s3] ss:$0 sm:$0xff]  ;;  %s386_s3 = smov [#allocation2]  }
   0xb   :  { %v359_v32 = vld [vmem:[%s494_s5] ss:$0 sm:$0xff]  ;;  %s249_s9 = sshll.u32 %s386_s3, 4  ;;  %s250_s9 = int_to_ptr.vmem [resolvable:$true] %s249_s9 }
   0xe   :  { %103 = vmatpush.bf16.msra.mxu0 %v343_v3  ;;  %211 = vmatpush.bf16.msra.mxu2 %v352_v11 }
  0x12   :  { %104 = vmatpush.bf16.msra.mxu0 %v342_v4  ;;  %212 = vmatpush.bf16.msra.mxu2 %v351_v12 }
  0x16   :  { %105 = vmatpush.bf16.msra.mxu0 %v341_v5  ;;  %213 = vmatpush.bf16.msra.mxu2 %v350_v17 }
  0x1a   :  { %106 = vmatpush.bf16.msra.mxu0 %v340_v6  ;;  %214 = vmatpush.bf16.msra.mxu2 %v349_v18 }
  0x1e   :  { %107 = vmatpush.bf16.msra.mxu0 %v339_v7  ;;  %215 = vmatpush.bf16.msra.mxu2 %v348_v19 }
  0x21   :  { %108 = vmatmul.bf16.vlgmr.msra.gmra.mxu0 %v338_v8 }
  0x22   :  { %216 = vmatpush.bf16.msra.mxu2 %v347_v20 }
  0x9e   :  { %v109_v13 = vpop.f32.mrf.mxu0 }
  0xa6   :  { %v111_v14 = vpop.f32.mrf.mxu0 }
  0xa7   :  { %v114_v15 = vpack.c.bf16 %v111_v14, %v109_v13 }
  0xa9   :  { %134 = vmatpush.bf16.msra.mxu1 %v114_v15 }
  0xac   :  { %303 = vmatmul.msk.bf16.vlgmr.msra.gmra.mxu1 %vm123_vm0, %v337_v16 }
 0x129   :  { %v136_v21 = vpop.f32.mrf.mxu1 }
 0x12a   :  { %v137_v23 = vadd.f32 %v358_v22, %v136_v21 }
 0x12c   :  { %v141_v26 = vmax.f32 %v137_v23, 0.0 }
 0x131   :  { %v138_v24 = vpop.f32.mrf.mxu1 }
 0x132   :  { %v139_v25 = vadd.f32 %v358_v22, %v138_v24 }
 0x134   :  { %v142_v27 = vmax.f32 %v139_v25, 0.0 }
 0x136   :  { %v143_v28 = vpack.c.bf16 %v142_v27, %v141_v26 }
 0x138   :  { %217 = vmatmul.bf16.vlgmr.msra.gmra.mxu2 %v143_v28 }
 0x1bb   :  { %v218_v29 = vpop.f32.mrf.mxu2 }
 0x1c3   :  { %v220_v30 = vpop.f32.mrf.mxu2 }
 0x1c4   :  { %v223_v31 = vpack.c.bf16 %v220_v30, %v218_v29 }
 0x1c6   :  { %234 = vmatpush.bf16.msra.mxu3 %v223_v31 }
 0x1c9   :  { %336 = vmatmul.msk.bf16.vlgmr.msra.gmra.mxu3 %vm123_vm0, %v337_v16 }
 0x24c   :  { %v236_v33 = vpop.f32.mrf.mxu3 }
 0x24d   :  { %v237_v34 = vadd.f32 %v359_v32, %v236_v33 }
 0x24f   :  { %v241_v35 = vmax.f32 %v237_v34, 0.0 }
 0x251   :  { %243 = vst [vmem:[#allocation2] sm:$0xff] %v241_v35 }
 0x254   :  { %v238_v36 = vpop.f32.mrf.mxu3 }
 0x255   :  { %v239_v37 = vadd.f32 %v359_v32, %v238_v36 }
 0x257   :  { %v242_v38 = vmax.f32 %v239_v37, 0.0 }
 0x259   :  { %244 = vst [vmem:[#allocation2 + $0x8] sm:$0xff] %v242_v38 }
 0x25a   :  { %257 = dma.vmem_to_hbm [thread:$0]  %s250_s9, 256, %s252_s12, [#allocation3], %s387_s13, %s387_s13, %s388_s14  }
 0x25b   :  { %384 = dma.done.wait [#allocation3], 256  }
 0x25c   :  { %385 = vsyncadd [#allocation3], 4294967040 }
 0x25d   :  { %262 = vsyncpa [#allocation3], 1 }

</bundles_post_ra>
